<compile_context>
chip_gen: v7x
topology: tpu7x:2x2x1
jax: 0.10.0
libtpu: 0.0.40
codegen_flags: <defaults>
</compile_context>

<pallas_src>
import numpy as np
import jax
import jax.numpy as jnp
from jax.experimental import pallas as pl
from jax.experimental.pallas import tpu as pltpu

_LANE = 128
_SUBLANE_ALIGN = 32            # multiple of the sublane tile for f32/bf16/int8 outputs
_FAST_PATH_BYTES = 256 << 10   # below this, XLA's fused convert beats a kernel launch
_LANE_CHOICES = (4096, 2048, 1024, 512, 256, 128)


# ----------------------------------------------------------------------------- kernel
def _cast_kernel(x_ref, o_ref):
    """Elementwise dtype cast / copy of one (rows, cols) VMEM block."""
    o_ref[...] = x_ref[...].astype(o_ref.dtype)


# ----------------------------------------------------------------------------- hw query
_HW = None


def _hw_params():
    """Per-generation block budget (in+out bytes per grid step) and VMEM cap."""
    global _HW
    if _HW is None:
        vmem_cap = 64 << 20  # conservative default (v7x per-TC physical VMEM)
        try:
            vmem_cap = int(pltpu.get_tpu_info().vmem_capacity_bytes)
        except Exception:
            try:
                kind = jax.devices()[0].device_kind.lower()
                if ("v5" in kind) or ("v6" in kind):
                    vmem_cap = 128 << 20
            except Exception:
                pass
        if vmem_cap >= (100 << 20):      # v5e / v6e: 128 MiB physical VMEM
            _HW = {"block_budget": 16 << 20, "vmem_cap_limit": 48 << 20}
        else:                            # v7x (64 MiB/TC) or unknown: stay conservative
            _HW = {"block_budget": 10 << 20, "vmem_cap_limit": 40 << 20}
    return _HW


# ----------------------------------------------------------------------------- helpers
def _align_down(v, m):
    return (v // m) * m


def _align_up(v, m):
    return ((v + m - 1) // m) * m


def _choose_block_rows(n_rows, n_cols, in_item, out_item, budget):
    """Largest 32-aligned row tile (or full extent) within the block budget."""
    per_row = max(n_cols * (in_item + out_item), 1)
    rows = _align_down(budget // per_row, _SUBLANE_ALIGN)
    rows = max(rows, _SUBLANE_ALIGN)
    if rows >= n_rows:
        return n_rows  # full extent along the row axis is always a legal block dim
    return rows        # 32-aligned tile < n_rows


def _best_ragged_view(shape, n, in_item, out_item, budget):
    """For numel % 128 != 0: pick the (rows, cols) reshape (flattening trailing
    dims) that maximizes the lane width while a >=32-row (or full-extent) block
    still fits the VMEM block budget.  Free, contiguous reshape — no data move."""
    best = None
    for k in range(len(shape)):
        rows = int(np.prod(shape[:k], dtype=np.int64)) if k > 0 else 1
        cols = n // rows
        block_rows = min(rows, _SUBLANE_ALIGN)
        if block_rows * cols * (in_item + out_item) <= budget:
            if best is None or cols > best[1]:
                best = (rows, cols)
    return best


# ----------------------------------------------------------------------------- wrappers
def _cast_2d(x2, target, block_rows):
    R, L = x2.shape
    in_item = np.dtype(x2.dtype).itemsize
    out_item = np.dtype(target).itemsize
    hw = _hw_params()
    in_bytes = block_rows * L * in_item
    out_bytes = block_rows * L * out_item
    # double-buffered in + out blocks, plus headroom; clamp to the per-chip cap.
    vmem_limit = int(min(max(2 * (in_bytes + out_bytes) + (2 << 20), 16 << 20),
                         hw["vmem_cap_limit"]))
    grid = (pl.cdiv(R, block_rows),)
    cost = pl.CostEstimate(
        flops=0, transcendentals=0,
        bytes_accessed=int(R) * int(L) * (in_item + out_item),
    )
    return pl.pallas_call(
        _cast_kernel,
        out_shape=jax.ShapeDtypeStruct((R, L), target),
        grid=grid,
        in_specs=[pl.BlockSpec((block_rows, L), lambda i: (i, 0))],
        out_specs=pl.BlockSpec((block_rows, L), lambda i: (i, 0)),
        compiler_params=pltpu.CompilerParams(
            dimension_semantics=("parallel",),
            vmem_limit_bytes=vmem_limit,
        ),
        cost_estimate=cost,
    )(x2)


def _to_dtype_pallas(x, target, *, block_rows=None, min_kernel_bytes=_FAST_PATH_BYTES):
    """Cast/copy `x` to dtype `target` with a streaming Pallas kernel."""
    target = np.dtype(target)
    n = int(x.size)
    in_item = np.dtype(x.dtype).itemsize
    out_item = target.itemsize

    if n == 0 or n * in_item < min_kernel_bytes:
        # Tiny tensors: kernel launch + pipeline prologue dominates; XLA convert wins.
        return x.astype(target)

    hw = _hw_params()
    budget = hw["block_budget"]

    if x.ndim == 0:
        x2 = x.reshape(1, 1)
    elif n % _LANE == 0:
        # Lane-dense flat view with the widest lane dim that divides numel:
        # long unmasked vld/vst runs, fewer rows, free contiguous reshape.
        L = next(l for l in _LANE_CHOICES if n % l == 0)
        x2 = x.reshape(n // L, L)
    else:
        view = _best_ragged_view(x.shape, n, in_item, out_item, budget)
        if view is None:
            # TODO(synk): pathological ragged shapes (single huge non-128-aligned
            # trailing dim) would need a column grid; fall back to XLA convert.
            return x.astype(target)
        x2 = x.reshape(view)

    R, L = x2.shape
    if block_rows is None:
        block_rows = _choose_block_rows(R, L, in_item, out_item, budget)
        if block_rows >= R:
            # Guarantee >= 2 grid steps when possible so the "parallel" axis
            # actually shards across both v7x TensorCores (harmless elsewhere).
            half = _align_up(pl.cdiv(R, 2), _SUBLANE_ALIGN)
            if half < R:
                block_rows = half
    else:
        block_rows = min(int(block_rows), R)
        if block_rows < R:
            block_rows = max(_SUBLANE_ALIGN, _align_down(block_rows, _SUBLANE_ALIGN))
            block_rows = min(block_rows, R)

    y2 = _cast_2d(x2, target, block_rows)
    return y2.reshape(x.shape)


class TensorToPallas:
    """Pallas equivalent of torchwrench.nn.modules.tensor.TensorTo.

    Supported kwargs: `dtype` (jax/numpy dtype or string), `copy`.
    `device`, `non_blocking`, `memory_format` are accepted but are no-ops on a
    single JAX TPU device.
    """

    def __init__(self, **kwargs):
        self.kwargs = dict(kwargs)
        dtype = kwargs.get("dtype", None)
        self.dtype = None if dtype is None else jax.dtypes.canonicalize_dtype(dtype)
        self.copy = bool(kwargs.get("copy", False))
        # TODO(synk): `device`, `non_blocking`, `memory_format` have no Pallas
        # equivalent on a single TPU device; they are ignored.

    def __call__(self, x):
        target = self.dtype if self.dtype is not None else np.dtype(x.dtype)
        if np.dtype(target) == np.dtype(x.dtype) and not self.copy:
            # torch.Tensor.to returns the same tensor when nothing changes.
            return x
        return _to_dtype_pallas(x, target)

    def extra_repr(self):
        return ", ".join(f"{k}={v}" for k, v in self.kwargs.items())


# ----------------------------------------------------------------------------- main
if __name__ == "__main__":
    key = jax.random.PRNGKey(0)
    x = jax.random.normal(key, (2, 4, 16, 16), dtype=jnp.float32)  # NCHW example

    # Case 1: dtype cast f32 -> bf16 (module path; tiny -> fast path) and the
    #         same cast forced through the Pallas kernel.
    to_bf16 = TensorToPallas(dtype=jnp.bfloat16)
    y = to_bf16(x)
    jax.block_until_ready(y)
    assert y.dtype == jnp.dtype(jnp.bfloat16)
    np.testing.assert_array_equal(np.asarray(y), np.asarray(x.astype(jnp.bfloat16)))
    yk = _to_dtype_pallas(x, jnp.bfloat16, min_kernel_bytes=0)  # force kernel
    jax.block_until_ready(yk)
    np.testing.assert_array_equal(np.asarray(yk), np.asarray(x.astype(jnp.bfloat16)))

    # Case 2: dtype cast f32 -> int32 (truncation toward zero), forced kernel.
    yi = _to_dtype_pallas(x, jnp.int32, min_kernel_bytes=0)
    jax.block_until_ready(yi)
    np.testing.assert_array_equal(np.asarray(yi), np.asarray(x.astype(jnp.int32)))

    # Case 3: same dtype, copy -> kernel copy is bit-exact.
    yc = _to_dtype_pallas(x, jnp.float32, min_kernel_bytes=0)
    jax.block_until_ready(yc)
    np.testing.assert_array_equal(np.asarray(yc), np.asarray(x))

    # Case 4: no conversion needed and copy=False -> returns the input itself.
    ident = TensorToPallas(dtype=jnp.float32)
    assert ident(x) is x

    # Case 5: ragged numel (not a multiple of 128) -> widened-lane ragged path.
    xr = jax.random.normal(jax.random.PRNGKey(1), (2, 3, 5, 7), dtype=jnp.float32)
    yr = _to_dtype_pallas(xr, jnp.bfloat16, min_kernel_bytes=0)
    jax.block_until_ready(yr)
    np.testing.assert_array_equal(np.asarray(yr), np.asarray(xr.astype(jnp.bfloat16)))

    # Case 6: multi-step grid with a partial final block (32-aligned tiles).
    xg = jax.random.normal(jax.random.PRNGKey(2), (200, 128), dtype=jnp.float32)
    yg = _cast_2d(xg, jnp.bfloat16, block_rows=64)   # grid = 4 steps, last partial
    jax.block_until_ready(yg)
    np.testing.assert_array_equal(np.asarray(yg), np.asarray(xg.astype(jnp.bfloat16)))

    # Case 7: larger lane-dense tensor goes through the kernel automatically
    #         with the widened lane dim and a >= 2-step parallel grid.
    xl = jax.random.normal(jax.random.PRNGKey(3), (256, 1024), dtype=jnp.float32)
    yl = TensorToPallas(dtype=jnp.bfloat16)(xl)
    jax.block_until_ready(yl)
    np.testing.assert_array_equal(np.asarray(yl), np.asarray(xl.astype(jnp.bfloat16)))

    print("KERNEL_OK")
</pallas_src>

<mosaic_0001>
module attributes {stable_mosaic.version = 11 : i64} {
  func.func @_cast_kernel(%arg0: i32, %arg1: memref<1x2048xf32, #tpu.memory_space<vmem>>, %arg2: memref<1x2048xbf16, #tpu.memory_space<vmem>>) attributes {dimension_semantics = [#tpu.dimension_semantics<parallel>], iteration_bounds = array<i64: 1>, scalar_prefetch = 0 : i64, scratch_operands = 0 : i64, tpu.core_type = #tpu.core_type<tc>, window_params = [{transform_indices = @transform_0, window_bounds = array<i64: 1, 2048>}, {transform_indices = @transform_1, window_bounds = array<i64: 1, 2048>}]} {
    %c0 = arith.constant 0 : index
    %c0_0 = arith.constant 0 : index
    %0 = vector.load %arg1[%c0, %c0_0] : memref<1x2048xf32, #tpu.memory_space<vmem>>, vector<1x2048xf32>
    %1 = arith.truncf %0 : vector<1x2048xf32> to vector<1x2048xbf16>
    %c0_1 = arith.constant 0 : index
    %c0_2 = arith.constant 0 : index
    %2 = vector.load %arg2[%c0_1, %c0_2] : memref<1x2048xbf16, #tpu.memory_space<vmem>>, vector<1x2048xbf16>
    tpu.vector_store %arg2[%c0_1, %c0_2], %1 {strides = array<i32>} : memref<1x2048xbf16, #tpu.memory_space<vmem>>, vector<1x2048xbf16>,
    return
  }
  func.func @transform_0(%arg0: i32) -> (i32, i32) {
    %c0_i32 = arith.constant 0 : i32
    %c0_i32_0 = arith.constant 0 : i32
    return %arg0, %c0_i32 : i32, i32
  }
  func.func @transform_1(%arg0: i32) -> (i32, i32) {
    %c0_i32 = arith.constant 0 : i32
    %c0_i32_0 = arith.constant 0 : i32
    return %arg0, %c0_i32 : i32, i32
  }
}

</mosaic_0001>

<bundles_post_ra>
// kernel: tpu_custom_call.1
= control target key start
LH: loop header
LB: loop body
LE: loop exit
PB: predicated region body
PF: predicated region fallthrough
CT: control target
= control target key end

     0   :  { %6 = vsyncpa [#allocation3], 0  ;;  %s445_s0 = inlined_call_operand.hbm [shape: f32[1,2048], index: 0, kind: input, shape index: {}]   ;;  %s446_s1 = inlined_call_operand.hbm [shape: bf16[1,2048], index: 1, kind: output, shape index: {}]  }
   0x1   :  { %7 = vsyncpa [#allocation4], 0  ;;  %s348_s6 = smov [#allocation2]   ;;  %s300_s10 = scalar_lea.hbm %s445_s0, 256 }
   0x2   :  { %s14_s7 = sshll.u32 %s348_s6, 4  ;;  %p301_p0 = scmp.ne.s32.totalorder %s445_s0, %s300_s10  ;;  %s15_s7 = int_to_ptr.vmem [resolvable:$true] %s14_s7 }
   0x3   :  { %p304_p1 = scmp.lt.u32.totalorder %s300_s10, %s445_s0 }
   0x5   :  { %p306_p2 = pnand %p304_p1, %p301_p0 }
   0x7   :  { %309 = shalt.err (!%p306_p2)
}
   0x8   :  { %s310_s15 = scalar_lea.vmem %s15_s7, 256  ;;  %p315_p4 = scmp.lt.s32.totalorder %s15_s7, %s15_s7 }
   0x9   :  { %p311_p3 = scmp.ne.s32.totalorder %s15_s7, %s310_s15  ;;  %p316_p5 = scmp.lt.s32.totalorder %s310_s15, %s310_s15 }
   0xb   :  { %p317_p6 = por %p316_p5, %p315_p4 }
   0xd   :  { %p318_p7 = pnand %p317_p6, %p311_p3 }
   0xf   :  { %321 = shalt.err (!%p318_p7)
}
  0x10   :  { %17 = dma.hbm_to_vmem [thread:$0]  %s445_s0, 256, %s15_s7, [#allocation3]  }
  0x11   :  { %344 = dma.done.wait [#allocation3], 256  }
  0x12   :  { %345 = vsyncadd [#allocation3], 4294967040  ;;  %v25_v0 = vlaneseq  ;;  %vm237_vm0 = vcmask 1040384   ;;  %vm240_vm1 = vcmask 1041409   ;;  %v349_v1 = vmov 1966171168  }
  0x13   :  { %v142_v2 = vunpack.c.l.s4 %v349_v1  ;;  %vm238_vm2 = vsmask.f32 256  ;;  %vm241_vm3 = vsmask.f32 1280  ;;  %vm244_vm5 = vcmask 1042434   ;;  %v21_v16 = vld [vmem:[#allocation2] sm:$0xff] }
  0x14   :  { %v26_v3 = vshrl.u32 %v25_v0, 7  ;;  %vm373_vm4 = vmand %vm237_vm0, %vm238_vm2  ;;  %vm245_vm6 = vsmask.f32 2304  ;;  %vm248_vm8 = vcmask 1043459   ;;  %vm249_vm9 = vsmask.f32 3328 }
  0x15   :  { %v143_v5 = vunpack.c.0.s8 %v142_v2  ;;  %vm377_vm7 = vmand %vm240_vm1, %vm241_vm3  ;;  %vm252_vm10 = vcmask 1044484   ;;  %vm253_vm14 = vsmask.f32 4352  ;;  %vm256_vm15 = vcmask 1045509   ;;  %v22_v23 = vld [vmem:[#allocation2 + $0x8] sm:$0xff]  ;;  %v268_v60 = vld [vmem:[#allocation5] sm:$0xff] }
  0x16   :  { %v27_v7 = vsub.s32 0, %v26_v3  ;;  %v31_v8 = vsub.s32 1, %v26_v3  ;;  %v35_v9 = vsub.s32 2, %v26_v3  ;;  %v39_v10 = vsub.s32 3, %v26_v3  ;;  %vm243_vm11 = vmor %vm377_vm7, %vm373_vm4  ;;  %s350_s0 = smov [#allocation5]  }
  0x17   :  { %v43_v11 = vsub.s32 4, %v26_v3  ;;  %v47_v12 = vsub.s32 5, %v26_v3  ;;  %v51_v13 = vsub.s32 6, %v26_v3  ;;  %v55_v14 = vsub.s32 7, %v26_v3  ;;  %vm246_vm12 = vmand %vm244_vm5, %vm245_vm6  ;;  %s280_s18 = sshll.u32 %s350_s0, 4  ;;  %s281_s18 = int_to_ptr.vmem [resolvable:$true] %s280_s18 }
  0x18   :  { %vm387_vm13 = vmor %vm246_vm12, %vm243_vm11  ;;  %vm257_vm0 = vsmask.f32 5376  ;;  %vm260_vm1 = vcmask 1046534   ;;  %v146_v17 = vsub.s32 %v143_v5, %v26_v3  ;;  %vm261_vm3 = vsmask.f32 6400  ;;  %v271_v3 = vld [vmem:[#allocation5 + $0x8] sm:$0xff]  ;;  %p327_p9 = scmp.lt.s32.totalorder %s281_s18, %s281_s18 }
  0x19   :  { %vm393_vm2 = vmand %vm248_vm8, %vm249_vm9  ;;  %vm264_vm4 = vcmask 1047559   ;;  %vm265_vm7 = vsmask.f32 7424  ;;  %v28_v19 = vrot.slane %v21_v16, %v27_v7  ;;  %v32_v20 = vrot.slane %v21_v16, %v31_v8  ;;  %s322_s19 = scalar_lea.vmem %s281_s18, 256 }
  0x1a   :  { %v36_v21 = vrot.slane %v21_v16, %v35_v9  ;;  %v40_v22 = vrot.slane %v21_v16, %v39_v10  ;;  %vm251_vm5 = vmor %vm393_vm2, %vm387_vm13  ;;  %v44_v24 = vrot.slane %v21_v16, %v43_v11  ;;  %v48_v25 = vrot.slane %v21_v16, %v47_v12  ;;  %p323_p8 = scmp.ne.s32.totalorder %s281_s18, %s322_s19  ;;  %p328_p10 = scmp.lt.s32.totalorder %s322_s19, %s322_s19 }
  0x1b   :  { %v52_v26 = vrot.slane %v21_v16, %v51_v13  ;;  %v56_v27 = vrot.slane %v21_v16, %v55_v14  ;;  %vm254_vm6 = vmand %vm252_vm10, %vm253_vm14  ;;  %v289_v28 = vpack.c.bf16 %v32_v20, %v28_v19  ;;  %v60_v31 = vrot.slane %v22_v23, %v27_v7 }
  0x1c   :  { %v290_v29 = vpack.c.bf16 %v40_v22, %v36_v21  ;;  %vm403_vm8 = vmor %vm254_vm6, %vm251_vm5  ;;  %v64_v32 = vrot.slane %v22_v23, %v31_v8  ;;  %v291_v33 = vpack.c.bf16 %v48_v25, %v44_v24  ;;  %v68_v36 = vrot.slane %v22_v23, %v35_v9  ;;  %p329_p11 = por %p328_p10, %p327_p9 }
  0x1d   :  { %v292_v34 = vpack.c.bf16 %v56_v27, %v52_v26  ;;  %vm409_vm9 = vmand %vm256_vm15, %vm257_vm0  ;;  %v72_v37 = vrot.slane %v22_v23, %v39_v10  ;;  %v147_v38 = vrot.slane %v289_v28, %v146_v17  ;;  %v76_v40 = vrot.slane %v22_v23, %v43_v11 }
  0x1e   :  { %v154_v39 = vrot.slane %v290_v29, %v146_v17  ;;  %vm259_vm10 = vmor %vm409_vm9, %vm403_vm8  ;;  %v80_v41 = vrot.slane %v22_v23, %v47_v12  ;;  %v161_v42 = vrot.slane %v291_v33, %v146_v17  ;;  %v84_v44 = vrot.slane %v22_v23, %v51_v13  ;;  %p330_p12 = pnand %p329_p11, %p323_p8 }
  0x1f   :  { %v168_v43 = vrot.slane %v292_v34, %v146_v17  ;;  %vm262_vm11 = vmand %vm260_vm1, %vm261_vm3  ;;  %v88_v45 = vrot.slane %v22_v23, %v55_v14  ;;  %v293_v48 = vpack.c.bf16 %v64_v32, %v60_v31  ;;  %v294_v49 = vpack.c.bf16 %v72_v37, %v68_v36 }
  0x20   :  { %v169_v46 = vcombine.low %v147_v38, %v154_v39  ;;  %vm419_vm12 = vmor %vm262_vm11, %vm259_vm10  ;;  %v295_v50 = vpack.c.bf16 %v80_v41, %v76_v40 }
  0x21   :  { %v170_v51 = vcombine.low %v161_v42, %v168_v43  ;;  %vm425_vm13 = vmand %vm264_vm4, %vm265_vm7  ;;  %v296_v53 = vpack.c.bf16 %v88_v45, %v84_v44  ;;  %v196_v55 = vrot.slane %v293_v48, %v146_v17  ;;  %v203_v56 = vrot.slane %v294_v49, %v146_v17 }
  0x22   :  { %v177_v54 = vrot.slane %v169_v46, %v146_v17  ;;  %v210_v57 = vrot.slane %v295_v50, %v146_v17  ;;  %vm267_vm14 = vmor %vm425_vm13, %vm419_vm12 }
  0x23   :  { %v184_v58 = vrot.slane %v170_v51, %v146_v17  ;;  %v217_v59 = vrot.slane %v296_v53, %v146_v17  ;;  %v218_v61 = vcombine.low %v196_v55, %v203_v56 }
  0x25   :  { %v185_v62 = vcombine.low %v177_v54, %v184_v58  ;;  %v219_v63 = vcombine.low %v210_v57, %v217_v59  ;;  %v226_v0 = vrot.slane %v218_v61, %v146_v17 }
  0x27   :  { %v269_v1 = vsel %vm267_vm14, %v185_v62, %v268_v60  ;;  %v233_v2 = vrot.slane %v219_v63, %v146_v17 }
  0x28   :  { %270 = vst [vmem:[#allocation5] sm:$0xff] %v269_v1 }
  0x29   :  { %v234_v4 = vcombine.low %v226_v0, %v233_v2 }
  0x2b   :  { %v272_v5 = vsel %vm267_vm14, %v234_v4, %v271_v3 }
  0x2c   :  { %273 = vst [vmem:[#allocation5 + $0x8] sm:$0xff] %v272_v5 }
  0x2d   :  { %333 = shalt.err (!%p330_p12)
}
  0x2e   :  { %s334_s22 = scalar_lea.hbm %s446_s1, 256 }
  0x2f   :  { %p335_p13 = scmp.ne.s32.totalorder %s446_s1, %s334_s22  ;;  %p338_p0 = scmp.lt.u32.totalorder %s334_s22, %s446_s1 }
  0x31   :  { %p340_p1 = pnand %p338_p0, %p335_p13 }
  0x33   :  { %343 = shalt.err (!%p340_p1)
}
  0x34   :  { %283 = dma.vmem_to_hbm [thread:$0]  %s281_s18, 256, %s446_s1, [#allocation4]  }
  0x35   :  { %346 = dma.done.wait [#allocation4], 256  }
  0x36   :  { %347 = vsyncadd [#allocation4], 4294967040 }
  0x37   :  { %287 = vsyncpa [#allocation3], 1 }
  0x38   :  { %288 = vsyncpa [#allocation4], 1 }

</bundles_post_ra>
